<compile_context>
chip_gen: v5e
topology: v5e:2x2
jax: 0.10.0
libtpu: 0.0.40
codegen_flags: <defaults>
</compile_context>

<pallas_src>
import functools

import jax
import jax.numpy as jnp
from jax.experimental import pallas as pl
from jax.experimental.pallas import tpu as pltpu

LN_EPS = 1e-5  # torch.nn.LayerNorm default
LANE = 128


def _round_up(x, m):
    return ((x + m - 1) // m) * m


def _cdiv(a, b):
    return -(-a // b)


def _layernorm_cols(x, gamma, beta):
    # Feature axis is axis 0 (sublanes); batch is on lanes.  Two-pass variance
    # is numerically safer than E[x^2] - mu^2.  rsqrt goes to the EUP slot.
    mu = jnp.mean(x, axis=0, keepdims=True)
    d = x - mu
    var = jnp.mean(d * d, axis=0, keepdims=True)
    return d * jax.lax.rsqrt(var + LN_EPS) * gamma + beta


def critic_kernel(xt_ref, at_ref, w1t_ref, w2t_ref, vec_ref, out_ref,
                  *, fc1, fc2, na):
    vecs = vec_ref[...]                                  # f32 (ph, 9 + na)
    b1, g1, be1 = vecs[:fc1, 0:1], vecs[:fc1, 1:2], vecs[:fc1, 2:3]
    b2, g2, be2 = vecs[:fc2, 3:4], vecs[:fc2, 4:5], vecs[:fc2, 5:6]
    ba, wq, bq = vecs[:fc2, 6:7], vecs[:fc2, 7:8], vecs[0:1, 8:9]

    # fc1 -> LayerNorm -> relu   (shapes are (features, batch); batch on lanes)
    h1 = jnp.dot(w1t_ref[...], xt_ref[...],
                 preferred_element_type=jnp.float32) + b1
    h1 = jnp.maximum(_layernorm_cols(h1, g1, be1), 0.0)

    # fc2 -> LayerNorm  (no relu on the state branch, matching PyTorch)
    h2 = jnp.dot(w2t_ref[...], h1.astype(w2t_ref.dtype),
                 preferred_element_type=jnp.float32) + b2
    h2 = _layernorm_cols(h2, g2, be2)

    # Action branch relu(W_a @ action + b_a) as a VPU broadcast-accumulate:
    # n_actions is tiny for DDPG, so no MXU pass and no block-diagonal zeros.
    at = at_ref[...]                                     # f32 (na, tile_b)
    acc = vecs[:fc2, 9:10] * at[0:1, :]
    for j in range(1, na):                               # static unroll, na small
        acc = acc + vecs[:fc2, 9 + j:10 + j] * at[j:j + 1, :]
    av = jnp.maximum(acc + ba, 0.0)

    sa = jnp.maximum(h2 + av, 0.0)
    # q head: VPU multiply + cross-sublane reduce -> already lane-dense row.
    q = jnp.sum(sa * wq, axis=0, keepdims=True) + bq     # (1, tile_b)
    out_ref[...] = q.astype(out_ref.dtype)


def pack_params(p, dtype=jnp.bfloat16):
    """Pack the 14 parameter tensors into 3 DMA-friendly, kernel-layout buffers.

    Kernel layout is transposed (out_features, in_features) i.e. the native
    torch.nn.Linear weight layout; all small vectors go into one f32 slab as
    columns (features on sublanes).
    """
    in_dims, fc1 = p["w1"].shape
    fc2 = p["w2"].shape[1]
    na = p["wa"].shape[0]
    ph = max(fc1, fc2)
    nvec = 9 + na

    vecs = jnp.zeros((ph, nvec), jnp.float32)
    vecs = vecs.at[:fc1, 0].set(p["b1"].reshape(-1))
    vecs = vecs.at[:fc1, 1].set(p["g1"].reshape(-1))
    vecs = vecs.at[:fc1, 2].set(p["be1"].reshape(-1))
    vecs = vecs.at[:fc2, 3].set(p["b2"].reshape(-1))
    vecs = vecs.at[:fc2, 4].set(p["g2"].reshape(-1))
    vecs = vecs.at[:fc2, 5].set(p["be2"].reshape(-1))
    vecs = vecs.at[:fc2, 6].set(p["ba"].reshape(-1))
    vecs = vecs.at[:fc2, 7].set(p["wq"].reshape(-1))
    vecs = vecs.at[0, 8].set(p["bq"].reshape(-1)[0])
    vecs = vecs.at[:fc2, 9:9 + na].set(p["wa"].T)        # action_value weight

    return {"w1t": p["w1"].T.astype(dtype),              # (fc1, in_dims)
            "w2t": p["w2"].T.astype(dtype),              # (fc2, fc1)
            "vecs": vecs,                                 # (ph, 9 + na) f32
            "dims": (in_dims, fc1, fc2, na)}


def critic_forward(state, action, packed, *, max_tile_b=2048):
    in_dims, fc1, fc2, na = packed["dims"]
    ph, nvec = packed["vecs"].shape
    wdtype = packed["w1t"].dtype
    wbytes = packed["w1t"].dtype.itemsize
    B = state.shape[0]

    # ---- batch tiling: batch lives on the 128-lane axis ---------------------
    b_ceil = _round_up(B, LANE)
    max_tile_b = max(LANE, (max_tile_b // LANE) * LANE)
    n_target = _cdiv(b_ceil, max_tile_b)
    if b_ceil >= 2 * LANE:
        n_target = max(n_target, 2)          # >=2 tiles -> both v7x TensorCores
    tile_b = _round_up(_cdiv(b_ceil, n_target), LANE)
    num_tiles = _cdiv(b_ceil, tile_b)
    b_pad = num_tiles * tile_b

    # ---- transposed (feature, batch) operands; tiny host-side XLA ops -------
    xt = state.astype(wdtype).T                          # (in_dims, B)
    at = action.astype(jnp.float32).T                    # (na, B) -> VPU in f32
    if b_pad != B:
        xt = jnp.pad(xt, ((0, 0), (0, b_pad - B)))
        at = jnp.pad(at, ((0, 0), (0, b_pad - B)))

    kernel = functools.partial(critic_kernel, fc1=fc1, fc2=fc2, na=na)

    flops = 2 * b_pad * (in_dims * fc1 + fc1 * fc2 + na * fc2 + fc2)
    bytes_accessed = (b_pad * in_dims * wbytes + b_pad * na * 4
                      + (fc1 * in_dims + fc2 * fc1) * wbytes
                      + ph * nvec * 4 + b_pad * 4)
    cost = pl.CostEstimate(flops=flops, transcendentals=2 * b_pad,
                           bytes_accessed=bytes_accessed)

    # Scoped-VMEM budget: double-buffered I/O tiles + resident weights + f32
    # intermediates, with headroom (v5e's scoped default is only 16 MiB).
    est = (2 * tile_b * (in_dims * wbytes + na * 4 + 4)
           + 2 * ((fc1 * in_dims + fc2 * fc1) * wbytes + ph * nvec * 4)
           + 2 * tile_b * (fc1 + 3 * fc2) * 4 + (1 << 20))
    vmem_limit = int(min(max(est, 32 << 20), 64 << 20))

    out = pl.pallas_call(
        kernel,
        out_shape=jax.ShapeDtypeStruct((1, b_pad), jnp.float32),
        grid_spec=pltpu.PrefetchScalarGridSpec(
            num_scalar_prefetch=0,
            grid=(num_tiles,),
            in_specs=[
                pl.BlockSpec((in_dims, tile_b), lambda i: (0, i)),
                pl.BlockSpec((na, tile_b), lambda i: (0, i)),
                # TODO(synk): pl.Buffered(1) on the three resident specs below
                # would halve their VMEM footprint on v7x; left default-buffered
                # since they are tiny at DDPG sizes.
                pl.BlockSpec((fc1, in_dims), lambda i: (0, 0)),   # resident
                pl.BlockSpec((fc2, fc1), lambda i: (0, 0)),       # resident
                pl.BlockSpec((ph, nvec), lambda i: (0, 0)),       # resident
            ],
            out_specs=pl.BlockSpec((1, tile_b), lambda i: (0, i)),
        ),
        compiler_params=pltpu.CompilerParams(
            dimension_semantics=("parallel",),
            vmem_limit_bytes=vmem_limit),
        cost_estimate=cost,
    )(xt, at, packed["w1t"], packed["w2t"], packed["vecs"])
    # NOTE: for tiny inference batches (B <= ~8) the pure-JAX reference path is
    # cheaper than any pallas_call; callers can route around the kernel there.
    return out[0, :B].reshape(B, 1)


def init_params(key, input_dims, fc1_dims, fc2_dims, n_actions):
    """Deterministic init mirroring the module's __init__ bounds.

    f1 = 1/sqrt(fc1.weight.size(0)), f2 = 1/sqrt(fc2.weight.size(0)), f3=0.003;
    action_value keeps PyTorch's default 1/sqrt(fan_in) bound.
    Weights here are stored (in_features, out_features) for the reference;
    pack_params transposes them into the kernel layout.
    """
    ks = jax.random.split(key, 8)
    f1 = 1.0 / jnp.sqrt(jnp.float32(fc1_dims))
    f2 = 1.0 / jnp.sqrt(jnp.float32(fc2_dims))
    f3 = 0.003
    fa = 1.0 / jnp.sqrt(jnp.float32(n_actions))
    u = lambda k, shp, b: jax.random.uniform(k, shp, jnp.float32, -b, b)
    return {
        "w1": u(ks[0], (input_dims, fc1_dims), f1),
        "b1": u(ks[1], (1, fc1_dims), f1),
        "g1": jnp.ones((1, fc1_dims), jnp.float32),
        "be1": jnp.zeros((1, fc1_dims), jnp.float32),
        "w2": u(ks[2], (fc1_dims, fc2_dims), f2),
        "b2": u(ks[3], (1, fc2_dims), f2),
        "g2": jnp.ones((1, fc2_dims), jnp.float32),
        "be2": jnp.zeros((1, fc2_dims), jnp.float32),
        "wa": u(ks[4], (n_actions, fc2_dims), fa),
        "ba": u(ks[5], (1, fc2_dims), fa),
        "wq": u(ks[6], (fc2_dims, 1), f3),
        "bq": u(ks[7], (1, 1), f3),
    }


def reference_forward(state, action, p):
    """Pure-JAX reference for correctness checking."""
    def ln(x, g, b):
        mu = jnp.mean(x, -1, keepdims=True)
        var = jnp.mean((x - mu) ** 2, -1, keepdims=True)
        return (x - mu) / jnp.sqrt(var + LN_EPS) * g + b

    h1 = jax.nn.relu(ln(state @ p["w1"] + p["b1"], p["g1"], p["be1"]))
    h2 = ln(h1 @ p["w2"] + p["b2"], p["g2"], p["be2"])
    a = jax.nn.relu(action @ p["wa"] + p["ba"])
    sa = jax.nn.relu(h2 + a)
    return sa @ p["wq"] + p["bq"]


if __name__ == "__main__":
    B, INPUT_DIMS, FC1, FC2, N_ACTIONS = 8, 16, 32, 32, 4

    key = jax.random.PRNGKey(0)
    k_state, k_action, k_params = jax.random.split(key, 3)

    state = jax.random.normal(k_state, (B, INPUT_DIMS), jnp.float32)
    action = jax.random.normal(k_action, (B, N_ACTIONS), jnp.float32)
    params = init_params(k_params, INPUT_DIMS, FC1, FC2, N_ACTIONS)

    q_ref = reference_forward(state, action, params)

    # f32-parameter path: tight check against the pure-JAX reference.
    q_f32 = critic_forward(state, action, pack_params(params, jnp.float32))
    q_f32 = jax.block_until_ready(q_f32)
    assert q_f32.shape == (B, 1)
    assert jnp.allclose(q_f32, q_ref, atol=1e-4, rtol=1e-4), (q_f32, q_ref)

    # Default bf16-weight path (perf config): looser tolerance for bf16 MXU.
    q_bf16 = critic_forward(state, action, pack_params(params))
    q_bf16 = jax.block_until_ready(q_bf16)
    assert q_bf16.shape == (B, 1)
    assert jnp.allclose(q_bf16, q_ref, atol=5e-3, rtol=5e-2), (q_bf16, q_ref)

    print("KERNEL_OK")
</pallas_src>

<mosaic_0001>
module attributes {stable_mosaic.version = 11 : i64} {
  func.func @critic_kernel(%arg0: i32, %arg1: memref<16x128xf32, #tpu.memory_space<vmem>>, %arg2: memref<4x128xf32, #tpu.memory_space<vmem>>, %arg3: memref<32x16xf32, #tpu.memory_space<vmem>>, %arg4: memref<32x32xf32, #tpu.memory_space<vmem>>, %arg5: memref<32x13xf32, #tpu.memory_space<vmem>>, %arg6: memref<1x128xf32, #tpu.memory_space<vmem>>) attributes {dimension_semantics = [#tpu.dimension_semantics<parallel>], iteration_bounds = array<i64: 1>, scalar_prefetch = 0 : i64, scratch_operands = 0 : i64, tpu.core_type = #tpu.core_type<tc>, window_params = [{transform_indices = @transform_0, window_bounds = array<i64: 16, 128>}, {transform_indices = @transform_1, window_bounds = array<i64: 4, 128>}, {pipeline_mode = #tpu.pipeline_mode<synchronous>, transform_indices = @transform_2, window_bounds = array<i64: 32, 16>}, {pipeline_mode = #tpu.pipeline_mode<synchronous>, transform_indices = @transform_3, window_bounds = array<i64: 32, 32>}, {pipeline_mode = #tpu.pipeline_mode<synchronous>, transform_indices = @transform_4, window_bounds = array<i64: 32, 13>}, {transform_indices = @transform_5, window_bounds = array<i64: 1, 128>}]} {
    %c0 = arith.constant 0 : index
    %c0_0 = arith.constant 0 : index
    %0 = vector.load %arg5[%c0, %c0_0] : memref<32x13xf32, #tpu.memory_space<vmem>>, vector<32x13xf32>
    %1 = vector.extract_strided_slice %0 {offsets = [0, 0], sizes = [32, 1], strides = [1, 1]} : vector<32x13xf32> to vector<32x1xf32>
    %2 = vector.extract_strided_slice %0 {offsets = [0, 1], sizes = [32, 1], strides = [1, 1]} : vector<32x13xf32> to vector<32x1xf32>
    %3 = vector.extract_strided_slice %0 {offsets = [0, 2], sizes = [32, 1], strides = [1, 1]} : vector<32x13xf32> to vector<32x1xf32>
    %4 = vector.extract_strided_slice %0 {offsets = [0, 3], sizes = [32, 1], strides = [1, 1]} : vector<32x13xf32> to vector<32x1xf32>
    %5 = vector.extract_strided_slice %0 {offsets = [0, 4], sizes = [32, 1], strides = [1, 1]} : vector<32x13xf32> to vector<32x1xf32>
    %6 = vector.extract_strided_slice %0 {offsets = [0, 5], sizes = [32, 1], strides = [1, 1]} : vector<32x13xf32> to vector<32x1xf32>
    %7 = vector.extract_strided_slice %0 {offsets = [0, 6], sizes = [32, 1], strides = [1, 1]} : vector<32x13xf32> to vector<32x1xf32>
    %8 = vector.extract_strided_slice %0 {offsets = [0, 7], sizes = [32, 1], strides = [1, 1]} : vector<32x13xf32> to vector<32x1xf32>
    %9 = vector.extract_strided_slice %0 {offsets = [0, 8], sizes = [1, 1], strides = [1, 1]} : vector<32x13xf32> to vector<1x1xf32>
    %c0_1 = arith.constant 0 : index
    %c0_2 = arith.constant 0 : index
    %10 = vector.load %arg3[%c0_1, %c0_2] : memref<32x16xf32, #tpu.memory_space<vmem>>, vector<32x16xf32>
    %c0_3 = arith.constant 0 : index
    %c0_4 = arith.constant 0 : index
    %11 = vector.load %arg1[%c0_3, %c0_4] : memref<16x128xf32, #tpu.memory_space<vmem>>, vector<16x128xf32>
    %cst = arith.constant dense<0.000000e+00> : vector<32x128xf32>
    %12 = tpu.matmul %10, %11, %cst {dimension_numbers = #tpu.dot_dimension_numbers<[1], [0], [0], [1], [0, 0, 1, 1], [], []>} : vector<32x16xf32>, vector<16x128xf32>, vector<32x128xf32> -> vector<32x128xf32>
    %13 = vector.broadcast %1 : vector<32x1xf32> to vector<32x128xf32>
    %14 = arith.addf %12, %13 : vector<32x128xf32>
    %cst_5 = arith.constant dense<0.000000e+00> : vector<128xf32>
    %15 = vector.multi_reduction <add>, %14, %cst_5 [0] : vector<32x128xf32> to vector<128xf32>
    %16 = vector.shape_cast %15 : vector<128xf32> to vector<1x128xf32>
    %cst_6 = arith.constant 3.200000e+01 : f32
    %17 = vector.broadcast %cst_6 : f32 to vector<1x128xf32>
    %18 = arith.divf %16, %17 : vector<1x128xf32>
    %19 = vector.broadcast %18 : vector<1x128xf32> to vector<32x128xf32>
    %20 = arith.subf %14, %19 : vector<32x128xf32>
    %21 = arith.mulf %20, %20 : vector<32x128xf32>
    %cst_7 = arith.constant dense<0.000000e+00> : vector<128xf32>
    %22 = vector.multi_reduction <add>, %21, %cst_7 [0] : vector<32x128xf32> to vector<128xf32>
    %23 = vector.shape_cast %22 : vector<128xf32> to vector<1x128xf32>
    %cst_8 = arith.constant 3.200000e+01 : f32
    %24 = vector.broadcast %cst_8 : f32 to vector<1x128xf32>
    %25 = arith.divf %23, %24 : vector<1x128xf32>
    %cst_9 = arith.constant 9.99999974E-6 : f32
    %26 = vector.broadcast %cst_9 : f32 to vector<1x128xf32>
    %27 = arith.addf %25, %26 : vector<1x128xf32>
    %28 = math.rsqrt %27 : vector<1x128xf32>
    %29 = vector.broadcast %28 : vector<1x128xf32> to vector<32x128xf32>
    %30 = arith.mulf %20, %29 : vector<32x128xf32>
    %31 = vector.broadcast %2 : vector<32x1xf32> to vector<32x128xf32>
    %32 = arith.mulf %30, %31 : vector<32x128xf32>
    %33 = vector.broadcast %3 : vector<32x1xf32> to vector<32x128xf32>
    %34 = arith.addf %32, %33 : vector<32x128xf32>
    %cst_10 = arith.constant 0.000000e+00 : f32
    %35 = vector.broadcast %cst_10 : f32 to vector<32x128xf32>
    %36 = arith.maximumf %34, %35 : vector<32x128xf32>
    %c0_11 = arith.constant 0 : index
    %c0_12 = arith.constant 0 : index
    %37 = vector.load %arg4[%c0_11, %c0_12] : memref<32x32xf32, #tpu.memory_space<vmem>>, vector<32x32xf32>
    %cst_13 = arith.constant dense<0.000000e+00> : vector<32x128xf32>
    %38 = tpu.matmul %37, %36, %cst_13 {dimension_numbers = #tpu.dot_dimension_numbers<[1], [0], [0], [1], [0, 0, 1, 1], [], []>} : vector<32x32xf32>, vector<32x128xf32>, vector<32x128xf32> -> vector<32x128xf32>
    %39 = vector.broadcast %4 : vector<32x1xf32> to vector<32x128xf32>
    %40 = arith.addf %38, %39 : vector<32x128xf32>
    %cst_14 = arith.constant dense<0.000000e+00> : vector<128xf32>
    %41 = vector.multi_reduction <add>, %40, %cst_14 [0] : vector<32x128xf32> to vector<128xf32>
    %42 = vector.shape_cast %41 : vector<128xf32> to vector<1x128xf32>
    %cst_15 = arith.constant 3.200000e+01 : f32
    %43 = vector.broadcast %cst_15 : f32 to vector<1x128xf32>
    %44 = arith.divf %42, %43 : vector<1x128xf32>
    %45 = vector.broadcast %44 : vector<1x128xf32> to vector<32x128xf32>
    %46 = arith.subf %40, %45 : vector<32x128xf32>
    %47 = arith.mulf %46, %46 : vector<32x128xf32>
    %cst_16 = arith.constant dense<0.000000e+00> : vector<128xf32>
    %48 = vector.multi_reduction <add>, %47, %cst_16 [0] : vector<32x128xf32> to vector<128xf32>
    %49 = vector.shape_cast %48 : vector<128xf32> to vector<1x128xf32>
    %cst_17 = arith.constant 3.200000e+01 : f32
    %50 = vector.broadcast %cst_17 : f32 to vector<1x128xf32>
    %51 = arith.divf %49, %50 : vector<1x128xf32>
    %cst_18 = arith.constant 9.99999974E-6 : f32
    %52 = vector.broadcast %cst_18 : f32 to vector<1x128xf32>
    %53 = arith.addf %51, %52 : vector<1x128xf32>
    %54 = math.rsqrt %53 : vector<1x128xf32>
    %55 = vector.broadcast %54 : vector<1x128xf32> to vector<32x128xf32>
    %56 = arith.mulf %46, %55 : vector<32x128xf32>
    %57 = vector.broadcast %5 : vector<32x1xf32> to vector<32x128xf32>
    %58 = arith.mulf %56, %57 : vector<32x128xf32>
    %59 = vector.broadcast %6 : vector<32x1xf32> to vector<32x128xf32>
    %60 = arith.addf %58, %59 : vector<32x128xf32>
    %c0_19 = arith.constant 0 : index
    %c0_20 = arith.constant 0 : index
    %61 = vector.load %arg2[%c0_19, %c0_20] : memref<4x128xf32, #tpu.memory_space<vmem>>, vector<4x128xf32>
    %62 = vector.extract_strided_slice %0 {offsets = [0, 9], sizes = [32, 1], strides = [1, 1]} : vector<32x13xf32> to vector<32x1xf32>
    %63 = vector.extract_strided_slice %61 {offsets = [0, 0], sizes = [1, 128], strides = [1, 1]} : vector<4x128xf32> to vector<1x128xf32>
    %64 = vector.broadcast %62 : vector<32x1xf32> to vector<32x128xf32>
    %65 = vector.broadcast %63 : vector<1x128xf32> to vector<32x128xf32>
    %66 = arith.mulf %64, %65 : vector<32x128xf32>
    %67 = vector.extract_strided_slice %0 {offsets = [0, 10], sizes = [32, 1], strides = [1, 1]} : vector<32x13xf32> to vector<32x1xf32>
    %68 = vector.extract_strided_slice %61 {offsets = [1, 0], sizes = [1, 128], strides = [1, 1]} : vector<4x128xf32> to vector<1x128xf32>
    %69 = vector.broadcast %67 : vector<32x1xf32> to vector<32x128xf32>
    %70 = vector.broadcast %68 : vector<1x128xf32> to vector<32x128xf32>
    %71 = arith.mulf %69, %70 : vector<32x128xf32>
    %72 = arith.addf %66, %71 : vector<32x128xf32>
    %73 = vector.extract_strided_slice %0 {offsets = [0, 11], sizes = [32, 1], strides = [1, 1]} : vector<32x13xf32> to vector<32x1xf32>
    %74 = vector.extract_strided_slice %61 {offsets = [2, 0], sizes = [1, 128], strides = [1, 1]} : vector<4x128xf32> to vector<1x128xf32>
    %75 = vector.broadcast %73 : vector<32x1xf32> to vector<32x128xf32>
    %76 = vector.broadcast %74 : vector<1x128xf32> to vector<32x128xf32>
    %77 = arith.mulf %75, %76 : vector<32x128xf32>
    %78 = arith.addf %72, %77 : vector<32x128xf32>
    %79 = vector.extract_strided_slice %0 {offsets = [0, 12], sizes = [32, 1], strides = [1, 1]} : vector<32x13xf32> to vector<32x1xf32>
    %80 = vector.extract_strided_slice %61 {offsets = [3, 0], sizes = [1, 128], strides = [1, 1]} : vector<4x128xf32> to vector<1x128xf32>
    %81 = vector.broadcast %79 : vector<32x1xf32> to vector<32x128xf32>
    %82 = vector.broadcast %80 : vector<1x128xf32> to vector<32x128xf32>
    %83 = arith.mulf %81, %82 : vector<32x128xf32>
    %84 = arith.addf %78, %83 : vector<32x128xf32>
    %85 = vector.broadcast %7 : vector<32x1xf32> to vector<32x128xf32>
    %86 = arith.addf %84, %85 : vector<32x128xf32>
    %cst_21 = arith.constant 0.000000e+00 : f32
    %87 = vector.broadcast %cst_21 : f32 to vector<32x128xf32>
    %88 = arith.maximumf %86, %87 : vector<32x128xf32>
    %89 = arith.addf %60, %88 : vector<32x128xf32>
    %cst_22 = arith.constant 0.000000e+00 : f32
    %90 = vector.broadcast %cst_22 : f32 to vector<32x128xf32>
    %91 = arith.maximumf %89, %90 : vector<32x128xf32>
    %92 = vector.broadcast %8 : vector<32x1xf32> to vector<32x128xf32>
    %93 = arith.mulf %91, %92 : vector<32x128xf32>
    %cst_23 = arith.constant dense<0.000000e+00> : vector<128xf32>
    %94 = vector.multi_reduction <add>, %93, %cst_23 [0] : vector<32x128xf32> to vector<128xf32>
    %95 = vector.shape_cast %94 : vector<128xf32> to vector<1x128xf32>
    %96 = vector.broadcast %9 : vector<1x1xf32> to vector<1x128xf32>
    %97 = arith.addf %95, %96 : vector<1x128xf32>
    %c0_24 = arith.constant 0 : index
    %c0_25 = arith.constant 0 : index
    %98 = vector.load %arg6[%c0_24, %c0_25] : memref<1x128xf32, #tpu.memory_space<vmem>>, vector<1x128xf32>
    tpu.vector_store %arg6[%c0_24, %c0_25], %97 {strides = array<i32>} : memref<1x128xf32, #tpu.memory_space<vmem>>, vector<1x128xf32>,
    return
  }
  func.func @transform_0(%arg0: i32) -> (i32, i32) {
    %c0_i32 = arith.constant 0 : i32
    %c0_i32_0 = arith.constant 0 : i32
    return %c0_i32, %arg0 : i32, i32
  }
  func.func @transform_1(%arg0: i32) -> (i32, i32) {
    %c0_i32 = arith.constant 0 : i32
    %c0_i32_0 = arith.constant 0 : i32
    return %c0_i32, %arg0 : i32, i32
  }
  func.func @transform_2(%arg0: i32) -> (i32, i32) {
    %c0_i32 = arith.constant 0 : i32
    %c0_i32_0 = arith.constant 0 : i32
    %c0_i32_1 = arith.constant 0 : i32
    return %c0_i32, %c0_i32_0 : i32, i32
  }
  func.func @transform_3(%arg0: i32) -> (i32, i32) {
    %c0_i32 = arith.constant 0 : i32
    %c0_i32_0 = arith.constant 0 : i32
    %c0_i32_1 = arith.constant 0 : i32
    return %c0_i32, %c0_i32_0 : i32, i32
  }
  func.func @transform_4(%arg0: i32) -> (i32, i32) {
    %c0_i32 = arith.constant 0 : i32
    %c0_i32_0 = arith.constant 0 : i32
    %c0_i32_1 = arith.constant 0 : i32
    return %c0_i32, %c0_i32_0 : i32, i32
  }
  func.func @transform_5(%arg0: i32) -> (i32, i32) {
    %c0_i32 = arith.constant 0 : i32
    %c0_i32_0 = arith.constant 0 : i32
    return %c0_i32, %arg0 : i32, i32
  }
}

</mosaic_0001>

<bundles_post_ra>
// kernel: tpu_custom_call.1
= control target key start
LH: loop header
LB: loop body
LE: loop exit
PB: predicated region body
PF: predicated region fallthrough
CT: control target
= control target key end

     0   :  { %vm51_vm0 = vcmask 130048   ;;  %v606_v4 = vmov 0   ;;  %s820_s0 = inlined_call_operand.vmem [shape: f32[16,128], index: 0, kind: input, shape index: {}]   ;;  %s821_s1 = inlined_call_operand.vmem [shape: f32[4,128], index: 1, kind: input, shape index: {}]   ;;  %s822_s2 = inlined_call_operand.vmem [shape: f32[32,16], index: 2, kind: input, shape index: {}]   ;;  %s823_s3 = inlined_call_operand.vmem [shape: f32[32,32], index: 3, kind: input, shape index: {}]   ;;  %s824_s4 = inlined_call_operand.vmem [shape: f32[32,13], index: 4, kind: input, shape index: {}]   ;;  %s825_s5 = inlined_call_operand.hbm [shape: f32[1,128], index: 5, kind: output, shape index: {}]  }
   0x1   :  { %v30_v0 = vld [vmem:[%s820_s0 + $0x8] sm:$0xff]  ;;  %v29_v1 = vld [vmem:[%s820_s0] sm:$0xff]  ;;  %541 = vset.pattern.permute.xlu0 %v606_v4  ;;  %542 = vset.pattern.permute.xlu1 %v606_v4  ;;  %v671_v6 = vld [vmem:[%s824_s4 + $0x10] sm:$0xff] }
   0x2   :  { %520 = vmatpush.msra.mxu3 %v30_v0  ;;  %v26_v2 = vld [vmem:[%s822_s2 + $0x8] sm:$0xff]  ;;  %78 = vmatpush.msra.mxu0 %v30_v0  ;;  %v25_v3 = vld [vmem:[%s822_s2] sm:$0xff] }
   0x3   :  { %v666_v5 = vld [vmem:[%s824_s4] sm:$0xff] }
   0x4   :  { %521 = vmatpush.msra.mxu3 %v29_v1  ;;  %79 = vmatpush.msra.mxu0 %v29_v1 }
   0x5   :  { %10 = vsyncpa [#allocation3], 0  ;;  %513 = vmatmul.msk.f32.vlgmr.msra.gmra.mxu3 %vm51_vm0, %v26_v2  ;;  %512 = vmatmul.msk.f32.vlgmr.msra.gmra.mxu0 %vm51_vm0, %v25_v3  ;;  %v680_v7 = vld [vmem:[%s824_s4 + $0x18] sm:$0xff]  ;;  %v607_v8 = vmov 1   ;;  %v27_v9 = vld [vmem:[%s822_s2 + $0x10] sm:$0xff]  ;;  %v608_v12 = vmov 2  }
   0x6   :  { %33 = vperm.xlu0 %541, %v666_v5   ;;  %43 = vperm.xlu1 %542, %v671_v6   ;;  %v689_v10 = vld [vmem:[%s824_s4 + $0x8] sm:$0xff]  ;;  %v28_v11 = vld [vmem:[%s822_s2 + $0x18] sm:$0xff]  ;;  %v609_v13 = vmov 3   ;;  %v610_v16 = vmov 32.0   ;;  %v611_v25 = vmov 4   ;;  %v612_v36 = vmov 5  }
   0x7   :  { %543 = vset.pattern.permute.xlu2 %v607_v8  ;;  %574 = vrcp.f32 %v610_v16  ;;  %v613_v53 = vmov 9   ;;  %v614_v0 = vmov 10   ;;  %v615_v4 = vmov 11   ;;  %s503_s22 = sshll.u32 %s825_s5, 4  ;;  %s504_s22 = int_to_ptr.hbm [resolvable:$true] %s503_s22 }
   0x8   :  { %156 = vperm.xlu2 %543, %v680_v7   ;;  %vm207_vm5 = vcmask 261120  }
   0xd   :  { %514 = vmatmul.msk.f32.gmra.mxu3 %vm51_vm0, %v27_v9  ;;  %v575_v21 = vpop.eup %574 }
   0xe   :  { %38 = vperm.xlu0 %541, %v689_v10   ;;  %48 = vperm.xlu1 %542, %v680_v7   ;;  %v103_v26 = vmul.f32 32.0, %v575_v21  ;;  %vm107_vm1 = vweird.f32 %v575_v21 }
  0x10   :  { %152 = vperm.xlu2 %543, %v671_v6   ;;  %v104_v32 = vsub.f32 1.0, %v103_v26 }
  0x12   :  { %v105_v35 = vmul.f32 %v575_v21, %v104_v32 }
  0x14   :  { %v106_v39 = vadd.f32 %v575_v21, %v105_v35 }
  0x15   :  { %515 = vmatmul.msk.f32.gmra.mxu3 %vm51_vm0, %v28_v11 }
  0x16   :  { %545 = vset.pattern.permute.xlu1 %v607_v8  ;;  %544 = vset.pattern.permute.xlu0 %v608_v12  ;;  %v714_v42 = vsel %vm107_vm1, %v575_v21, %v106_v39  ;;  %v187_v39 = vld [vmem:[%s823_s3] sm:$0xff] }
  0x17   :  { %148 = vperm.xlu1 %545, %v689_v10   ;;  %176 = vperm.xlu0 %544, %v680_v7  }
  0x18   :  { %546 = vset.pattern.permute.xlu2 %v608_v12 }
  0x19   :  { %172 = vperm.xlu2 %546, %v671_v6  }
  0x1f   :  { %144 = vperm.xlu1 %545, %v666_v5   ;;  %164 = vperm.xlu0 %544, %v666_v5  }
  0x21   :  { %168 = vperm.xlu2 %546, %v689_v10  }
  0x27   :  { %547 = vset.pattern.permute.xlu1 %v609_v13  ;;  %549 = vset.pattern.permute.xlu0 %v609_v13 }
  0x28   :  { %192 = vperm.xlu1 %547, %v666_v5   ;;  %200 = vperm.xlu0 %549, %v671_v6  }
  0x29   :  { %548 = vset.pattern.permute.xlu2 %v609_v13 }
  0x2a   :  { %196 = vperm.xlu2 %548, %v689_v10  }
  0x30   :  { %204 = vperm.xlu1 %547, %v680_v7   ;;  %552 = vset.pattern.permute.xlu0 %v611_v25 }
  0x31   :  { %305 = vperm.xlu0 %552, %v680_v7  }
  0x32   :  { %550 = vset.pattern.permute.xlu2 %v611_v25 }
  0x33   :  { %293 = vperm.xlu2 %550, %v666_v5  }
  0x38   :  { %551 = vset.pattern.permute.xlu1 %v611_v25 }
  0x39   :  { %297 = vperm.xlu1 %551, %v689_v10   ;;  %555 = vset.pattern.permute.xlu0 %v613_v53 }
  0x3a   :  { %334 = vperm.xlu0 %555, %v666_v5  }
  0x3b   :  { %301 = vperm.xlu2 %550, %v671_v6  }
  0x41   :  { %553 = vset.pattern.permute.xlu1 %v612_v36 }
  0x42   :  { %313 = vperm.xlu1 %553, %v666_v5   ;;  %559 = vset.pattern.permute.xlu0 %v614_v0 }
  0x43   :  { %554 = vset.pattern.permute.xlu2 %v612_v36  ;;  %359 = vperm.xlu0 %559, %v689_v10  }
  0x44   :  { %317 = vperm.xlu2 %554, %v689_v10  }
  0x4a   :  { %321 = vperm.xlu1 %553, %v671_v6  }
  0x4b   :  { %563 = vset.pattern.permute.xlu0 %v615_v4 }
  0x4c   :  { %325 = vperm.xlu2 %554, %v680_v7   ;;  %388 = vperm.xlu0 %563, %v671_v6  }
  0x52   :  { %556 = vset.pattern.permute.xlu1 %v613_v53 }
  0x53   :  { %338 = vperm.xlu1 %556, %v689_v10  }
  0x54   :  { %557 = vset.pattern.permute.xlu2 %v613_v53 }
  0x55   :  { %342 = vperm.xlu2 %557, %v671_v6  }
  0x5b   :  { %346 = vperm.xlu1 %556, %v680_v7  }
  0x5d   :  { %558 = vset.pattern.permute.xlu2 %v614_v0 }
  0x5e   :  { %355 = vperm.xlu2 %558, %v666_v5  }
  0x62   :  { %v157_v62 = vpop.permute.xlu2 %156 }
  0x63   :  { %560 = vset.pattern.permute.xlu1 %v614_v0 }
  0x64   :  { %363 = vperm.xlu1 %560, %v671_v6  }
  0x66   :  { %367 = vperm.xlu2 %558, %v680_v7  }
  0x6a   :  { %v153_v3 = vpop.permute.xlu2 %152 }
  0x6c   :  { %561 = vset.pattern.permute.xlu1 %v615_v4 }
  0x6d   :  { %380 = vperm.xlu1 %561, %v666_v5  }
  0x6e   :  { %562 = vset.pattern.permute.xlu2 %v615_v4 }
  0x6f   :  { %384 = vperm.xlu2 %562, %v689_v10  }
  0x75   :  { %392 = vperm.xlu1 %561, %v680_v7  }
  0x78   :  { %v34_v14 = vpop.permute.xlu0 %33  ;;  %v44_v17 = vpop.permute.xlu1 %43 }
  0x80   :  { %v39_v18 = vpop.permute.xlu0 %38  ;;  %v49_v28 = vpop.permute.xlu1 %48 }
  0x82   :  { %v81_v19 = vpop.f32.mrf.mxu0 }
  0x83   :  { %v82_v22 = vadd.f32 %v81_v19, %v34_v14 }
  0x88   :  { %v84_v15 = vpop.f32.mrf.mxu3 }
  0x89   :  { %v85_v23 = vadd.f32 %v84_v15, %v39_v18  ;;  %v149_v13 = vpop.permute.xlu1 %148  ;;  %v173_v15 = vpop.permute.xlu2 %172  ;;  %v616_v18 = vmov 12  }
  0x8a   :  { %566 = vset.pattern.permute.xlu0 %v616_v18  ;;  %565 = vset.pattern.permute.xlu1 %v616_v18 }
  0x8b   :  { %v93_v27 = vadd.f32 %v85_v23, %v82_v22  ;;  %417 = vperm.xlu0 %566, %v680_v7   ;;  %564 = vset.pattern.permute.xlu2 %v616_v18 }
  0x8c   :  { %409 = vperm.xlu1 %565, %v689_v10   ;;  %405 = vperm.xlu2 %564, %v666_v5  }
  0x90   :  { %v87_v20 = vpop.f32.mrf.mxu3 }
  0x91   :  { %v88_v24 = vadd.f32 %v87_v20, %v44_v17  ;;  %v177_v17 = vpop.permute.xlu0 %176 }
  0x93   :  { %v94_v30 = vadd.f32 %v93_v27, %v88_v24  ;;  %v145_v27 = vpop.permute.xlu1 %144 }
  0x94   :  { %413 = vperm.xlu2 %564, %v671_v6  }
  0x98   :  { %v90_v29 = vpop.f32.mrf.mxu3 }
  0x99   :  { %v91_v31 = vadd.f32 %v90_v29, %v49_v28 }
  0x9b   :  { %v95_v33 = vadd.f32 %v94_v30, %v91_v31 }
  0x9d   :  { %v96_v34 = vrot.slane %v95_v33, 4 }
  0x9f   :  { %v97_v37 = vadd.f32 %v96_v34, %v95_v33  ;;  %v165_v34 = vpop.permute.xlu0 %164 }
  0xa1   :  { %v98_v38 = vrot.slane %v97_v37, 2 }
  0xa3   :  { %v99_v40 = vadd.f32 %v98_v38, %v97_v37 }
  0xa5   :  { %v100_v41 = vrot.slane %v99_v40, 1 }
  0xa7   :  { %v101_v43 = vadd.f32 %v100_v41, %v99_v40  ;;  %v189_v40 = vld [vmem:[%s823_s3 + $0x10] sm:$0xff]  ;;  %v617_v41 = vmov 6  }
  0xa8   :  { %567 = vset.pattern.permute.xlu1 %v617_v41  ;;  %568 = vset.pattern.permute.xlu2 %v617_v41 }
  0xa9   :  { %v109_v44 = vmul.f32 %v714_v42, %v101_v43  ;;  %430 = vperm.xlu1 %567, %v666_v5   ;;  %v188_v43 = vld [vmem:[%s823_s3 + $0x8] sm:$0xff]  ;;  %434 = vperm.xlu2 %568, %v689_v10  }
  0xab   :  { %v719_v45 = vsub.f32 %v82_v22, %v109_v44  ;;  %v721_v46 = vsub.f32 %v85_v23, %v109_v44  ;;  %v112_v47 = vsub.f32 %v88_v24, %v109_v44  ;;  %v113_v48 = vsub.f32 %v91_v31, %v109_v44  ;;  %v169_v31 = vpop.permute.xlu2 %168  ;;  %v190_v44 = vld [vmem:[%s823_s3 + $0x18] sm:$0xff] }
  0xad   :  { %v114_v49 = vmul.f32 %v719_v45, %v719_v45  ;;  %v115_v50 = vmul.f32 %v721_v46, %v721_v46  ;;  %v116_v51 = vmul.f32 %v112_v47, %v112_v47  ;;  %v117_v54 = vmul.f32 %v113_v48, %v113_v48 }
  0xaf   :  { %v118_v52 = vadd.f32 %v115_v50, %v114_v49 }
  0xb1   :  { %v119_v55 = vadd.f32 %v118_v52, %v116_v51  ;;  %438 = vperm.xlu1 %567, %v671_v6   ;;  %442 = vperm.xlu2 %568, %v680_v7  }
  0xb3   :  { %v120_v56 = vadd.f32 %v119_v55, %v117_v54  ;;  %v619_v54 = vmov 8  }
  0xb5   :  { %v121_v57 = vrot.slane %v120_v56, 4 }
  0xb7   :  { %v122_v58 = vadd.f32 %v121_v57, %v120_v56 }
  0xb9   :  { %v123_v59 = vrot.slane %v122_v58, 2 }
  0xbb   :  { %v124_v60 = vadd.f32 %v123_v59, %v122_v58 }
  0xbd   :  { %v125_v61 = vrot.slane %v124_v60, 1 }
  0xbf   :  { %v126_v63 = vadd.f32 %v125_v61, %v124_v60 }
  0xc1   :  { %v127_v1 = vmul.f32 %v126_v63, %v714_v42 }
  0xc3   :  { %v128_v2 = vadd.f32 1e-05, %v127_v1 }
  0xc5   :  { %576 = vrsqrt.f32 %v128_v2  ;;  %vm135_vm3 = vweird.f32 %v128_v2 }
  0xcb   :  { %v577_v8 = vpop.eup %576 }
  0xcc   :  { %v130_v9 = vmul.f32 %v577_v8, %v128_v2  ;;  %vm136_vm2 = vweird.f32 %v577_v8 }
  0xcd   :  { %vm137_vm4 = vmor %vm135_vm3, %vm136_vm2 }
  0xce   :  { %v131_v11 = vmul.f32 %v577_v8, %v130_v9 }
  0xd0   :  { %v132_v12 = vmul.f32 0.5, %v131_v11 }
  0xd2   :  { %v133_v14 = vsub.f32 1.5, %v132_v12 }
  0xd4   :  { %v134_v16 = vmul.f32 %v577_v8, %v133_v14 }
  0xd6   :  { %v138_v19 = vsel %vm137_vm4, %v577_v8, %v134_v16 }
  0xd7   :  { %v142_v20 = vmul.f32 %v138_v19, %v113_v48  ;;  %v141_v21 = vmul.f32 %v138_v19, %v112_v47  ;;  %v140_v22 = vmul.f32 %v138_v19, %v721_v46  ;;  %v139_v23 = vmul.f32 %v138_v19, %v719_v45  ;;  %v193_v46 = vpop.permute.xlu1 %192  ;;  %v197_v47 = vpop.permute.xlu2 %196 }
  0xd8   :  { %v618_v45 = vmov 7  }
  0xd9   :  { %v162_v24 = vmul.f32 %v157_v62, %v142_v20  ;;  %v161_v25 = vmul.f32 %v153_v3, %v141_v21  ;;  %v160_v26 = vmul.f32 %v149_v13, %v140_v22  ;;  %v159_v30 = vmul.f32 %v145_v27, %v139_v23  ;;  %569 = vset.pattern.permute.xlu0 %v618_v45  ;;  %v201_v62 = vpop.permute.xlu0 %200 }
  0xda   :  { %462 = vperm.xlu0 %569, %v666_v5   ;;  %570 = vset.pattern.permute.xlu1 %v618_v45 }
  0xdb   :  { %v181_v28 = vadd.f32 %v173_v15, %v161_v25  ;;  %v182_v29 = vadd.f32 %v177_v17, %v162_v24  ;;  %v180_v33 = vadd.f32 %v169_v31, %v160_v26  ;;  %v179_v36 = vadd.f32 %v165_v34, %v159_v30  ;;  %466 = vperm.xlu1 %570, %v689_v10  }
  0xdc   :  { %571 = vset.pattern.permute.xlu2 %v618_v45 }
  0xdd   :  { %v186_v32 = vmax.f32 %v182_v29, 0.0  ;;  %v185_v35 = vmax.f32 %v181_v28, 0.0  ;;  %v184_v37 = vmax.f32 %v180_v33, 0.0  ;;  %v183_v38 = vmax.f32 %v179_v36, 0.0  ;;  %470 = vperm.xlu2 %571, %v671_v6  }
  0xdf   :  { %232 = vmatpush.msra.mxu1 %v186_v32  ;;  %522 = vmatpush.msra.mxu2 %v186_v32  ;;  %v205_v48 = vpop.permute.xlu1 %204  ;;  %v767_v49 = vpop.permute.xlu2 %293 }
  0xe1   :  { %233 = vmatpush.msra.mxu1 %v185_v35  ;;  %523 = vmatpush.msra.mxu2 %v185_v35  ;;  %v782_v14 = vpop.permute.xlu0 %305 }
  0xe2   :  { %573 = vset.pattern.permute.xlu0 %v619_v54 }
  0xe3   :  { %234 = vmatpush.msra.mxu1 %v184_v37  ;;  %524 = vmatpush.msra.mxu2 %v184_v37 }
  0xe4   :  { %474 = vperm.xlu1 %570, %v680_v7  }
  0xe5   :  { %235 = vmatpush.msra.mxu1 %v183_v38  ;;  %525 = vmatpush.msra.mxu2 %v183_v38 }
  0xe6   :  { %516 = vmatmul.msk.f32.vlgmr.msra.gmra.mxu1 %vm207_vm5, %v187_v39  ;;  %518 = vmatmul.msk.f32.vlgmr.msra.gmra.mxu2 %vm207_vm5, %v189_v40  ;;  %v332_v40 = vld [vmem:[%s821_s1] sm:$0xf]  ;;  %s620_s1 = smov [#allocation2]  }
  0xe7   :  { %v769_v50 = vpop.permute.xlu1 %297  ;;  %v771_v51 = vpop.permute.xlu2 %301  ;;  %572 = vset.pattern.permute.xlu2 %v619_v54  ;;  %s501_s19 = sshll.u32 %s620_s1, 4  ;;  %s502_s19 = int_to_ptr.vmem [resolvable:$true] %s501_s19 }
  0xe8   :  { %491 = vperm.xlu2 %572, %v666_v5  }
  0xe9   :  { %v335_v24 = vpop.permute.xlu0 %334 }
  0xee   :  { %517 = vmatmul.msk.f32.gmra.mxu1 %vm207_vm5, %v188_v43  ;;  %519 = vmatmul.msk.f32.gmra.mxu2 %vm207_vm5, %v190_v44 }
  0xef   :  { %v773_v52 = vpop.permute.xlu1 %313  ;;  %v775_v53 = vpop.permute.xlu2 %317 }
  0xf1   :  { %v360_v36 = vpop.permute.xlu0 %359 }
  0xf7   :  { %v778_v6 = vpop.permute.xlu1 %321  ;;  %v780_v7 = vpop.permute.xlu2 %325 }
  0xff   :  { %v339_v55 = vpop.permute.xlu1 %338  ;;  %v343_v56 = vpop.permute.xlu2 %342 }
 0x107   :  { %v347_v63 = vpop.permute.xlu1 %346  ;;  %v356_v0 = vpop.permute.xlu2 %355 }
 0x10f   :  { %v364_v11 = vpop.permute.xlu1 %363  ;;  %v368_v12 = vpop.permute.xlu2 %367 }
 0x117   :  { %v381_v19 = vpop.permute.xlu1 %380  ;;  %v385_v20 = vpop.permute.xlu2 %384 }
 0x11f   :  { %v393_v33 = vpop.permute.xlu1 %392  ;;  %v406_v34 = vpop.permute.xlu2 %405 }
 0x127   :  { %v410_v43 = vpop.permute.xlu1 %409  ;;  %v414_v44 = vpop.permute.xlu2 %413 }
 0x163   :  { %v237_v10 = vpop.f32.mrf.mxu1 }
 0x164   :  { %v238_v59 = vadd.f32 %v237_v10, %v193_v46  ;;  %v349_v46 = vperm.slane %v332_v40, 0 }
 0x169   :  { %v243_v57 = vpop.f32.mrf.mxu2 }
 0x16a   :  { %v244_v1 = vadd.f32 %v243_v57, %v201_v62  ;;  %v351_v57 = vmul.f32 %v349_v46, %v339_v55  ;;  %v352_v62 = vmul.f32 %v349_v46, %v343_v56 }
 0x16b   :  { %v240_v58 = vpop.f32.mrf.mxu1 }
 0x16c   :  { %v241_v60 = vadd.f32 %v240_v58, %v197_v47  ;;  %v389_v47 = vpop.permute.xlu0 %388  ;;  %v395_v58 = vperm.slane %v332_v40, 2 }
 0x16e   :  { %v249_v61 = vadd.f32 %v241_v60, %v238_v59  ;;  %v398_v55 = vmul.f32 %v395_v58, %v389_v47 }
 0x170   :  { %v250_v4 = vadd.f32 %v249_v61, %v244_v1 }
 0x171   :  { %v246_v2 = vpop.f32.mrf.mxu2 }
 0x172   :  { %v247_v3 = vadd.f32 %v246_v2, %v205_v48  ;;  %v370_v48 = vperm.slane %v332_v40, 1 }
 0x174   :  { %v251_v5 = vadd.f32 %v250_v4, %v247_v3  ;;  %v372_v61 = vmul.f32 %v370_v48, %v360_v36  ;;  %v373_v2 = vmul.f32 %v370_v48, %v364_v11  ;;  %v420_v4 = vperm.slane %v332_v40, 3 }
 0x176   :  { %v252_v8 = vrot.slane %v251_v5, 4  ;;  %v422_v56 = vmul.f32 %v420_v4, %v410_v43 }
 0x178   :  { %v253_v9 = vadd.f32 %v252_v8, %v251_v5  ;;  %v431_v5 = vpop.permute.xlu1 %430 }
 0x17a   :  { %v254_v13 = vrot.slane %v253_v9, 2 }
 0x17c   :  { %v255_v15 = vadd.f32 %v254_v13, %v253_v9  ;;  %v397_v9 = vmul.f32 %v395_v58, %v385_v20  ;;  %v376_v13 = vadd.f32 %v372_v61, %v351_v57 }
 0x17e   :  { %v256_v16 = vrot.slane %v255_v15, 1 }
 0x180   :  { %v257_v17 = vadd.f32 %v256_v16, %v255_v15  ;;  %v399_v15 = vmul.f32 %v395_v58, %v393_v33  ;;  %v435_v16 = vpop.permute.xlu2 %434 }
 0x182   :  { %v258_v18 = vmul.f32 %v257_v17, %v714_v42  ;;  %v377_v17 = vadd.f32 %v373_v2, %v352_v62 }
 0x184   :  { %v785_v21 = vsub.f32 %v238_v59, %v258_v18  ;;  %v787_v22 = vsub.f32 %v241_v60, %v258_v18  ;;  %v789_v23 = vsub.f32 %v244_v1, %v258_v18  ;;  %v791_v25 = vsub.f32 %v247_v3, %v258_v18 }
 0x185   :  { %v353_v59 = vmul.f32 %v349_v46, %v347_v63  ;;  %v374_v60 = vmul.f32 %v370_v48, %v368_v12  ;;  %v371_v1 = vmul.f32 %v370_v48, %v356_v0  ;;  %v350_v3 = vmul.f32 %v349_v46, %v335_v24 }
 0x186   :  { %v263_v26 = vmul.f32 %v785_v21, %v785_v21  ;;  %v264_v27 = vmul.f32 %v787_v22, %v787_v22  ;;  %v265_v28 = vmul.f32 %v789_v23, %v789_v23  ;;  %v266_v30 = vmul.f32 %v791_v25, %v791_v25 }
 0x187   :  { %v378_v8 = vadd.f32 %v374_v60, %v353_v59  ;;  %v396_v18 = vmul.f32 %v395_v58, %v381_v19  ;;  %v421_v12 = vmul.f32 %v420_v4, %v406_v34  ;;  %v401_v0 = vadd.f32 %v397_v9, %v376_v13  ;;  %v439_v19 = vpop.permute.xlu1 %438 }
 0x188   :  { %v267_v29 = vadd.f32 %v264_v27, %v263_v26  ;;  %v418_v26 = vpop.permute.xlu0 %417 }
 0x189   :  { %v424_v11 = vmul.f32 %v420_v4, %v418_v26 }
 0x18a   :  { %v268_v31 = vadd.f32 %v267_v29, %v265_v28  ;;  %v403_v28 = vadd.f32 %v399_v15, %v378_v8  ;;  %v423_v29 = vmul.f32 %v420_v4, %v414_v44 }
 0x18c   :  { %v269_v32 = vadd.f32 %v268_v31, %v266_v30  ;;  %v402_v30 = vadd.f32 %v398_v55, %v377_v17  ;;  %v428_v33 = vadd.f32 %v424_v11, %v403_v28 }
 0x18e   :  { %v270_v35 = vrot.slane %v269_v32, 4 }
 0x190   :  { %v271_v37 = vadd.f32 %v270_v35, %v269_v32  ;;  %v426_v32 = vadd.f32 %v422_v56, %v401_v0 }
 0x192   :  { %v272_v38 = vrot.slane %v271_v37, 2  ;;  %v446_v34 = vadd.f32 %v435_v16, %v426_v32 }
 0x194   :  { %v273_v39 = vadd.f32 %v272_v38, %v271_v37  ;;  %v427_v37 = vadd.f32 %v423_v29, %v402_v30  ;;  %v443_v38 = vpop.permute.xlu2 %442  ;;  %v450_v59 = vmax.f32 %v446_v34, 0.0 }
 0x195   :  { %v448_v43 = vadd.f32 %v443_v38, %v428_v33 }
 0x196   :  { %v274_v41 = vrot.slane %v273_v39, 1 }
 0x197   :  { %v452_v61 = vmax.f32 %v448_v43, 0.0 }
 0x198   :  { %v275_v45 = vadd.f32 %v274_v41, %v273_v39 }
 0x19a   :  { %v276_v54 = vmul.f32 %v275_v45, %v714_v42  ;;  %v375_v42 = vadd.f32 %v371_v1, %v350_v3  ;;  %v447_v45 = vadd.f32 %v439_v19, %v427_v37  ;;  %v467_v1 = vpop.permute.xlu1 %466 }
 0x19c   :  { %v277_v10 = vadd.f32 1e-05, %v276_v54  ;;  %v400_v24 = vadd.f32 %v396_v18, %v375_v42  ;;  %v451_v62 = vmax.f32 %v447_v45, 0.0  ;;  %v471_v8 = vpop.permute.xlu2 %470 }
 0x19e   :  { %578 = vrsqrt.f32 %v277_v10  ;;  %v425_v36 = vadd.f32 %v421_v12, %v400_v24  ;;  %vm284_vm7 = vweird.f32 %v277_v10 }
 0x1a0   :  { %v445_v41 = vadd.f32 %v431_v5, %v425_v36 }
 0x1a2   :  { %v449_v60 = vmax.f32 %v445_v41, 0.0  ;;  %v475_v17 = vpop.permute.xlu1 %474 }
 0x1a4   :  { %v579_v63 = vpop.eup %578  ;;  %v492_v12 = vpop.permute.xlu2 %491 }
 0x1a5   :  { %v279_v27 = vmul.f32 %v579_v63, %v277_v10  ;;  %vm285_vm6 = vweird.f32 %v579_v63 }
 0x1a6   :  { %vm286_vm8 = vmor %vm284_vm7, %vm285_vm6 }
 0x1a7   :  { %v280_v31 = vmul.f32 %v579_v63, %v279_v27 }
 0x1a9   :  { %v281_v20 = vmul.f32 0.5, %v280_v31 }
 0x1ab   :  { %v282_v35 = vsub.f32 1.5, %v281_v20 }
 0x1ad   :  { %v283_v39 = vmul.f32 %v579_v63, %v282_v35 }
 0x1af   :  { %v287_v40 = vsel %vm286_vm8, %v579_v63, %v283_v39 }
 0x1b0   :  { %v291_v44 = vmul.f32 %v287_v40, %v791_v25  ;;  %v289_v46 = vmul.f32 %v287_v40, %v787_v22  ;;  %v290_v47 = vmul.f32 %v287_v40, %v789_v23  ;;  %v288_v48 = vmul.f32 %v287_v40, %v785_v21 }
 0x1b2   :  { %v311_v54 = vmul.f32 %v782_v14, %v291_v44  ;;  %v309_v57 = vmul.f32 %v769_v50, %v289_v46  ;;  %v310_v10 = vmul.f32 %v771_v51, %v290_v47  ;;  %v308_v58 = vmul.f32 %v767_v49, %v288_v48  ;;  %v463_v51 = vpop.permute.xlu0 %462 }
 0x1b4   :  { %v329_v25 = vadd.f32 %v775_v53, %v309_v57  ;;  %v331_v22 = vadd.f32 %v780_v7, %v311_v54  ;;  %v330_v23 = vadd.f32 %v778_v6, %v310_v10  ;;  %v328_v21 = vadd.f32 %v773_v52, %v308_v58 }
 0x1b6   :  { %v454_v14 = vadd.f32 %v450_v59, %v329_v25  ;;  %v456_v2 = vadd.f32 %v452_v61, %v331_v22  ;;  %v455_v50 = vadd.f32 %v451_v62, %v330_v23  ;;  %v453_v3 = vadd.f32 %v449_v60, %v328_v21 }
 0x1b8   :  { %v458_v4 = vmax.f32 %v454_v14, 0.0  ;;  %v459_v49 = vmax.f32 %v455_v50, 0.0  ;;  %v457_v5 = vmax.f32 %v453_v3, 0.0  ;;  %v460_v13 = vmax.f32 %v456_v2, 0.0 }
 0x1ba   :  { %v478_v9 = vmul.f32 %v467_v1, %v458_v4  ;;  %v477_v15 = vmul.f32 %v463_v51, %v457_v5  ;;  %v479_v16 = vmul.f32 %v471_v8, %v459_v49  ;;  %v480_v7 = vmul.f32 %v475_v17, %v460_v13 }
 0x1bc   :  { %v481_v53 = vadd.f32 %v478_v9, %v477_v15 }
 0x1be   :  { %v482_v42 = vadd.f32 %v481_v53, %v479_v16 }
 0x1c0   :  { %v483_v6 = vadd.f32 %v482_v42, %v480_v7 }
 0x1c2   :  { %v484_v18 = vrot.slane %v483_v6, 4 }
 0x1c4   :  { %v485_v52 = vadd.f32 %v484_v18, %v483_v6 }
 0x1c6   :  { %v486_v55 = vrot.slane %v485_v52, 2 }
 0x1c8   :  { %v487_v26 = vadd.f32 %v486_v55, %v485_v52 }
 0x1ca   :  { %v488_v63 = vrot.slane %v487_v26, 1 }
 0x1cc   :  { %v489_v27 = vadd.f32 %v488_v63, %v487_v26 }
 0x1ce   :  { %v494_v28 = vadd.f32 %v492_v12, %v489_v27 }
 0x1d0   :  { %495 = vst [vmem:[#allocation2] sm:$0x1] %v494_v28 }
 0x1d1   :  { %506 = dma.vmem_to_hbm [thread:$0]  %s502_s19, 16, %s504_s22, [#allocation3]  }
 0x1d2   :  { %604 = dma.done.wait [#allocation3], 16  }
 0x1d3   :  { %605 = vsyncadd [#allocation3], 4294967280 }
 0x1d4   :  { %511 = vsyncpa [#allocation3], 1 }

</bundles_post_ra>
